<compile_context>
chip_gen: v5e
topology: v5e:2x2
jax: 0.10.0
libtpu: 0.0.40
codegen_flags: <defaults>
</compile_context>

<pallas_src>
from collections import defaultdict, namedtuple
from functools import partial

import numpy as np
import jax
import jax.numpy as jnp
from jax import lax
from jax.experimental import pallas as pl
from jax.experimental.pallas import tpu as pltpu

ClusterMask = namedtuple("ClusterMask", ["batch_id", "group_id", "class_id", "scores"])

_PAD_SCORE = np.float32(-1.0e4)   # exp(-1e4) == 0 in f32 -> padded BCE term is exactly 0
_PAD_CID = np.int32(-1)           # never matches a (>= 0) group id -> padded gt is 0


# --------------------------------------------------------------------------- kernel
def _mask_stats_kernel(scores_ref, gid_ref, cid_ref, out_ref,
                       bce_acc, inter_acc, union_acc, *, n_points):
    k = pl.program_id(1)
    g_tile, C, chunk = scores_ref.shape          # (chunk-groups, masks, lanes)

    @pl.when(k == 0)
    def _():
        bce_acc[...] = jnp.zeros_like(bce_acc)
        inter_acc[...] = jnp.zeros_like(inter_acc)
        union_acc[...] = jnp.zeros_like(union_acc)

    # target cluster id per mask; broadcast across chunk lanes once (hoisted out of loop)
    gid_b = jnp.broadcast_to(gid_ref[...], (C, chunk))            # (C, chunk) int32

    def body(j, carry):
        bce_p, inter_p, union_p = carry
        s = scores_ref[j]                                          # (C, chunk) f32 logits
        cid = cid_ref[j]                                           # (1, chunk) int32 labels
        g = (cid == gid_b).astype(jnp.float32)                     # on-the-fly ground truth
        pred = (s > 0.0).astype(jnp.float32)
        # numerically stable BCE-with-logits; padded columns (s=-1e4, g=0) give exactly 0
        bce = jnp.maximum(s, 0.0) - s * g + jnp.log1p(jnp.exp(-jnp.abs(s)))
        pg = pred * g
        return (bce_p + bce, inter_p + pg, union_p + (pred + g - pg))

    zero = jnp.zeros((C, chunk), jnp.float32)
    bce_p, inter_p, union_p = lax.fori_loop(0, g_tile, body, (zero, zero, zero))

    # lane-wise accumulation across grid steps; cross-lane reduce deferred to finalize
    bce_acc[...] += bce_p
    inter_acc[...] += inter_p
    union_acc[...] += union_p

    @pl.when(k == pl.num_programs(1) - 1)
    def _():
        loss = jnp.sum(bce_acc[...], axis=-1, keepdims=True) * (1.0 / n_points)
        inter = jnp.sum(inter_acc[...], axis=-1, keepdims=True)
        union = jnp.sum(union_acc[...], axis=-1, keepdims=True)
        iou = (inter + 1e-6) / (union + 1e-6)
        # single lane-dense store: lane 0 = loss, lane 1 = iou, rest 0
        lane = jax.lax.broadcasted_iota(jnp.int32, out_ref.shape, 1)
        out_ref[...] = jnp.where(lane == 0, loss, jnp.where(lane == 1, iou, 0.0))


# --------------------------------------------------------------------------- tiling helpers
def _pick_chunk(C):
    # keep per-chunk intermediates at ~4 vregs: shrink chunk lanes as masks (C) grow
    sub_groups = (C + 7) // 8
    return 128 * max(1, min(4, 4 // sub_groups))


def _pick_tiling(C, N, chunk, target_block_bytes):
    groups_needed = -(-N // chunk)
    bytes_per_group = C * chunk * 4
    budget_groups = max(1, target_block_bytes // bytes_per_group)
    k_steps = -(-groups_needed // budget_groups)
    g_tile = -(-groups_needed // k_steps)
    return g_tile, k_steps


def _pack_inputs(scores, group_ids, cluster_ids, chunk, g_total):
    """Host-side (numpy) pad + pack into the (B, G, C, chunk) kernel layout.

    Doing this on host avoids any extra device-side pad/transpose pass over the
    logits stream in HBM (the kernel then reads each logit exactly once)."""
    B, C, N = scores.shape
    n_pad = g_total * chunk
    sp = np.full((B, C, n_pad), _PAD_SCORE, dtype=np.float32)
    sp[:, :, :N] = scores
    sp = np.ascontiguousarray(
        sp.reshape(B, C, g_total, chunk).transpose(0, 2, 1, 3))    # (B, G, C, chunk)
    cid = np.full((B, n_pad), _PAD_CID, dtype=np.int32)
    cid[:, :N] = np.asarray(cluster_ids).astype(np.int32)
    cid = cid.reshape(B, g_total, 1, chunk)
    gid = np.asarray(group_ids).astype(np.int32).reshape(B, C, 1)
    return sp, cid, gid


@partial(jax.jit, static_argnames=("n_points", "g_tile"))
def _mask_stats_packed(scores_p, gid_p, cid_p, *, n_points, g_tile):
    B, G, C, chunk = scores_p.shape
    k_steps = G // g_tile
    out = pl.pallas_call(
        partial(_mask_stats_kernel, n_points=n_points),
        out_shape=jax.ShapeDtypeStruct((B, C, 128), jnp.float32),
        grid_spec=pltpu.PrefetchScalarGridSpec(
            num_scalar_prefetch=0,
            grid=(B, k_steps),
            in_specs=[
                # logits slab: contiguous (g_tile, C, chunk) region, ~4 MiB per step
                pl.BlockSpec((None, g_tile, C, chunk), lambda b, k: (b, k, 0, 0)),
                # target cluster id per mask (tiny, resident)
                pl.BlockSpec((None, C, 1), lambda b, k: (b, 0, 0)),
                # per-point cluster labels (shared by all C masks of the event)
                pl.BlockSpec((None, g_tile, 1, chunk), lambda b, k: (b, k, 0, 0)),
            ],
            out_specs=pl.BlockSpec((None, C, 128), lambda b, k: (b, 0, 0)),
            scratch_shapes=[pltpu.VMEM((C, chunk), jnp.float32)] * 3,
        ),
        compiler_params=pltpu.CompilerParams(
            dimension_semantics=("parallel", "arbitrary"),
            vmem_limit_bytes=32 * 1024 * 1024),
    )(scores_p, gid_p, cid_p)
    return out[:, :, 0], out[:, :, 1]


def mask_stats(scores, group_ids, cluster_ids, *, target_block_bytes=4 << 20):
    """Per-mask BCE-with-logits mean loss and IoU (scores > 0 vs gt).

    scores      : (B, C, N) f32 logits, one row per generated mask
    group_ids   : (B, C)    target cluster id per mask (>= 0)
    cluster_ids : (B, N)    per-point cluster label (>= 0)
    returns (loss, iou) numpy arrays, each (B, C).
    """
    scores = np.asarray(scores, dtype=np.float32)
    group_ids = np.asarray(group_ids)
    cluster_ids = np.asarray(cluster_ids)
    assert (np.asarray(group_ids, dtype=np.int64) >= 0).all(), "group ids must be >= 0"
    B, C, N = scores.shape
    chunk = _pick_chunk(C)
    g_tile, k_steps = _pick_tiling(C, N, chunk, target_block_bytes)
    g_total = g_tile * k_steps
    sp, cid, gid = _pack_inputs(scores, group_ids, cluster_ids, chunk, g_total)
    loss, iou = _mask_stats_packed(jnp.asarray(sp), jnp.asarray(gid), jnp.asarray(cid),
                                   n_points=N, g_tile=g_tile)
    loss, iou = jax.block_until_ready((loss, iou))
    return np.asarray(loss), np.asarray(iou)


# --------------------------------------------------------------------------- module
class SequentialMaskLossJAX:
    """JAX/Pallas port of SequentialMaskLoss (BCE loss scheme)."""

    def __init__(self, cfg, name="clustering_loss"):
        self.loss_config = cfg["modules"][name]
        self.loss_scheme = self.loss_config.get("loss_scheme", "BCE")
        if self.loss_scheme != "BCE":
            # TODO(synk): lovasz_hinge_flat / focal schemes not ported.
            raise NotImplementedError

    def forward(self, cluster_masks, labels):
        labels_np = np.asarray(labels)
        batch_ids = np.unique(labels_np[:, 3])

        scores_list, gid_list, cid_list, class_ids, num_clusters = [], [], [], [], []
        for bidx in batch_ids:
            clabels = labels_np[labels_np[:, 3] == bidx]
            num_clusters.append(len(np.unique(clabels[:, -1])))
            cid_list.append(clabels[:, -1])
            masks_b = cluster_masks[int(bidx)]
            sb, gb, cb = [], [], []
            for m in masks_b:
                assert int(bidx) == m.batch_id
                sb.append(np.asarray(m.scores, dtype=np.float32))
                gb.append(int(m.group_id))
                cb.append(m.class_id)
            scores_list.append(np.stack(sb))
            gid_list.append(np.asarray(gb))
            class_ids.append(cb)

        # Synthetic setup: equal N and C per event -> dense (B, C, N) / (B, N) packing.
        # TODO(synk): ragged events would need per-event padding + valid lengths.
        scores_arr = np.stack(scores_list)          # (B, C, N)
        gid_arr = np.stack(gid_list)                # (B, C)
        cid_arr = np.stack(cid_list)                # (B, N)

        loss_bc, iou_bc = mask_stats(scores_arr, gid_arr, cid_arr)

        loss_dict = defaultdict(list)
        total_loss, total_acc = 0.0, 0.0
        for bi in range(len(batch_ids)):
            nc = num_clusters[bi]
            total_loss += float(loss_bc[bi].sum()) / nc
            total_acc += float(iou_bc[bi].sum()) / nc
            for ci, class_id in enumerate(class_ids[bi]):
                loss_dict["mask_loss_{}".format(class_id)].append(float(loss_bc[bi, ci]))
                loss_dict["acc_{}".format(class_id)].append(float(iou_bc[bi, ci]))
        total_loss /= len(batch_ids)
        total_acc /= len(batch_ids)

        res = {k: sum(v) / len(v) for k, v in loss_dict.items()}
        res["mask_loss"] = total_loss
        res["accuracy"] = total_acc
        return res


# --------------------------------------------------------------------------- reference
def reference_forward(cluster_masks, labels):
    labels_np = np.asarray(labels)
    batch_ids = np.unique(labels_np[:, 3])
    loss, acc = 0.0, 0.0
    for bidx in batch_ids:
        clabels = labels_np[labels_np[:, 3] == bidx]
        nc = len(np.unique(clabels[:, -1]))
        le, ae = 0.0, 0.0
        for m in cluster_masks[int(bidx)]:
            gt = (clabels[:, -1] == m.group_id).astype(np.float64)
            s = np.asarray(m.scores, dtype=np.float64)
            bce = np.mean(np.maximum(s, 0.0) - s * gt + np.log1p(np.exp(-np.abs(s))))
            pred = (s > 0).astype(np.float64)
            inter = np.sum(pred * gt)
            union = np.sum(np.maximum(pred, gt))
            le += bce
            ae += (inter + 1e-6) / (union + 1e-6)
        loss += le / nc
        acc += ae / nc
    return loss / len(batch_ids), acc / len(batch_ids)


# --------------------------------------------------------------------------- main
if __name__ == "__main__":
    # Small but non-trivial: C=4 exercises the un-padded C block path,
    # N=1500 exercises chunking (3 x 512-lane chunks) and column padding (36 cols).
    B, C, N = 2, 4, 1500
    key = jax.random.PRNGKey(0)
    k_coord, k_cid, k_score = jax.random.split(key, 3)

    # labels: (B*N, 5) = [x, y, z, batch_id, cluster_id]
    coords = jax.random.uniform(k_coord, (B * N, 3), dtype=jnp.float32)
    batch_col = jnp.repeat(jnp.arange(B, dtype=jnp.float32), N)[:, None]
    cid_cols = []
    for b in range(B):
        base = jnp.arange(N, dtype=jnp.int32) % C               # every cluster present
        perm = jax.random.permutation(jax.random.fold_in(k_cid, b), base)
        cid_cols.append(perm.astype(jnp.float32))
    cid_col = jnp.concatenate(cid_cols)[:, None]
    labels = jnp.concatenate([coords, batch_col, cid_col], axis=1)

    # cluster_masks: per event, a list of namedtuples with per-point logits
    cluster_masks = []
    for b in range(B):
        masks_b = []
        for c in range(C):
            ks = jax.random.fold_in(k_score, b * C + c)
            scores = jax.random.normal(ks, (N,), dtype=jnp.float32)
            masks_b.append(ClusterMask(batch_id=b, group_id=c, class_id=c % 2, scores=scores))
        cluster_masks.append(masks_b)

    cfg = {"modules": {"clustering_loss": {"loss_scheme": "BCE"}}}
    loss_module = SequentialMaskLossJAX(cfg)
    res = loss_module.forward(cluster_masks, labels)

    ref_loss, ref_acc = reference_forward(cluster_masks, labels)
    np.testing.assert_allclose(res["mask_loss"], ref_loss, rtol=1e-4, atol=1e-6)
    np.testing.assert_allclose(res["accuracy"], ref_acc, rtol=1e-4, atol=1e-6)

    # extra check: per-mask stats and the multi-grid-step (K > 1) accumulation path
    loss_ref = np.zeros((B, C))
    iou_ref = np.zeros((B, C))
    cid_np = np.stack([np.asarray(c) for c in cid_cols])         # (B, N)
    for b in range(B):
        for c, m in enumerate(cluster_masks[b]):
            s = np.asarray(m.scores, dtype=np.float64)
            gt = (cid_np[b] == m.group_id).astype(np.float64)
            loss_ref[b, c] = np.mean(np.maximum(s, 0.0) - s * gt + np.log1p(np.exp(-np.abs(s))))
            pred = (s > 0).astype(np.float64)
            inter = np.sum(pred * gt)
            union = np.sum(np.maximum(pred, gt))
            iou_ref[b, c] = (inter + 1e-6) / (union + 1e-6)
    scores_arr = np.stack([np.stack([np.asarray(m.scores, np.float32) for m in masks_b])
                           for masks_b in cluster_masks])
    gid_arr = np.array([[m.group_id for m in masks_b] for masks_b in cluster_masks])
    loss_small, iou_small = mask_stats(scores_arr, gid_arr, cid_np,
                                       target_block_bytes=4096)  # forces k_steps > 1
    np.testing.assert_allclose(loss_small, loss_ref, rtol=1e-4, atol=1e-6)
    np.testing.assert_allclose(iou_small, iou_ref, rtol=1e-4, atol=1e-6)

    print("KERNEL_OK")
</pallas_src>

<mosaic_0001>
module attributes {stable_mosaic.version = 11 : i64} {
  func.func @_mask_stats_kernel(%arg0: i32, %arg1: i32, %arg2: memref<1x3x4x512xf32, #tpu.memory_space<vmem>>, %arg3: memref<1x4x1xi32, #tpu.memory_space<vmem>>, %arg4: memref<1x3x1x512xi32, #tpu.memory_space<vmem>>, %arg5: memref<1x4x128xf32, #tpu.memory_space<vmem>>, %arg6: memref<4x512xf32, #tpu.memory_space<vmem>>, %arg7: memref<4x512xf32, #tpu.memory_space<vmem>>, %arg8: memref<4x512xf32, #tpu.memory_space<vmem>>) attributes {dimension_semantics = [#tpu.dimension_semantics<parallel>, #tpu.dimension_semantics<arbitrary>], iteration_bounds = array<i64: 2, 1>, scalar_prefetch = 0 : i64, scratch_operands = 3 : i64, tpu.core_type = #tpu.core_type<tc>, window_params = [{transform_indices = @transform_0, window_bounds = array<i64: 1, 3, 4, 512>}, {transform_indices = @transform_1, window_bounds = array<i64: 1, 4, 1>}, {transform_indices = @transform_2, window_bounds = array<i64: 1, 3, 1, 512>}, {transform_indices = @transform_3, window_bounds = array<i64: 1, 4, 128>}]} {
    %c0_i32 = arith.constant 0 : i32
    %0 = arith.cmpi eq, %arg1, %c0_i32 : i32
    %1 = arith.extui %0 : i1 to i32
    %c0_i32_0 = arith.constant 0 : i32
    %2 = arith.cmpi ne, %1, %c0_i32_0 : i32
    scf.if %2 {
      %cst_19 = arith.constant 0.000000e+00 : f32
      %22 = vector.broadcast %cst_19 : f32 to vector<4x512xf32>
      %c0_20 = arith.constant 0 : index
      %c0_21 = arith.constant 0 : index
      %23 = vector.load %arg6[%c0_20, %c0_21] : memref<4x512xf32, #tpu.memory_space<vmem>>, vector<4x512xf32>
      tpu.vector_store %arg6[%c0_20, %c0_21], %22 {strides = array<i32>} : memref<4x512xf32, #tpu.memory_space<vmem>>, vector<4x512xf32>,
      %cst_22 = arith.constant 0.000000e+00 : f32
      %24 = vector.broadcast %cst_22 : f32 to vector<4x512xf32>
      %c0_23 = arith.constant 0 : index
      %c0_24 = arith.constant 0 : index
      %25 = vector.load %arg7[%c0_23, %c0_24] : memref<4x512xf32, #tpu.memory_space<vmem>>, vector<4x512xf32>
      tpu.vector_store %arg7[%c0_23, %c0_24], %24 {strides = array<i32>} : memref<4x512xf32, #tpu.memory_space<vmem>>, vector<4x512xf32>,
      %cst_25 = arith.constant 0.000000e+00 : f32
      %26 = vector.broadcast %cst_25 : f32 to vector<4x512xf32>
      %c0_26 = arith.constant 0 : index
      %c0_27 = arith.constant 0 : index
      %27 = vector.load %arg8[%c0_26, %c0_27] : memref<4x512xf32, #tpu.memory_space<vmem>>, vector<4x512xf32>
      tpu.vector_store %arg8[%c0_26, %c0_27], %26 {strides = array<i32>} : memref<4x512xf32, #tpu.memory_space<vmem>>, vector<4x512xf32>,
    } else {
    }
    %c0 = arith.constant 0 : index
    %c0_1 = arith.constant 0 : index
    %c0_2 = arith.constant 0 : index
    %3 = vector.load %arg3[%c0, %c0_1, %c0_2] : memref<1x4x1xi32, #tpu.memory_space<vmem>>, vector<1x4x1xi32>
    %4 = vector.shape_cast %3 : vector<1x4x1xi32> to vector<4x1xi32>
    %5 = vector.shape_cast %4 : vector<4x1xi32> to vector<4x1xi32>
    %6 = vector.broadcast %5 : vector<4x1xi32> to vector<4x512xi32>
    %cst = arith.constant 0.000000e+00 : f32
    %7 = vector.broadcast %cst : f32 to vector<4x512xf32>
    %c0_i32_3 = arith.constant 0 : i32
    %c3_i32 = arith.constant 3 : i32
    %8 = arith.addi %c0_i32_3, %c3_i32 : i32
    %c1_i32 = arith.constant 1 : i32
    %9:3 = scf.for %arg9 = %c0_i32_3 to %8 step %c1_i32 iter_args(%arg10 = %7, %arg11 = %7, %arg12 = %7) -> (vector<4x512xf32>, vector<4x512xf32>, vector<4x512xf32>)  : i32 {
      %c0_19 = arith.constant 0 : index
      %22 = arith.index_cast %arg9 : i32 to index
      %c0_20 = arith.constant 0 : index
      %c0_21 = arith.constant 0 : index
      %23 = vector.load %arg2[%c0_19, %22, %c0_20, %c0_21] : memref<1x3x4x512xf32, #tpu.memory_space<vmem>>, vector<1x1x4x512xf32>
      %24 = vector.shape_cast %23 : vector<1x1x4x512xf32> to vector<4x512xf32>
      %c0_22 = arith.constant 0 : index
      %25 = arith.index_cast %arg9 : i32 to index
      %c0_23 = arith.constant 0 : index
      %c0_24 = arith.constant 0 : index
      %26 = vector.load %arg4[%c0_22, %25, %c0_23, %c0_24] : memref<1x3x1x512xi32, #tpu.memory_space<vmem>>, vector<1x1x1x512xi32>
      %27 = vector.shape_cast %26 : vector<1x1x1x512xi32> to vector<1x512xi32>
      %28 = vector.broadcast %27 : vector<1x512xi32> to vector<4x512xi32>
      %29 = arith.cmpi eq, %28, %6 : vector<4x512xi32>
      %30 = arith.extui %29 : vector<4x512xi1> to vector<4x512xi32>
      %31 = arith.sitofp %30 : vector<4x512xi32> to vector<4x512xf32>
      %cst_25 = arith.constant 0.000000e+00 : f32
      %32 = vector.broadcast %cst_25 : f32 to vector<4x512xf32>
      %33 = arith.cmpf ogt, %24, %32 : vector<4x512xf32>
      %34 = arith.extui %33 : vector<4x512xi1> to vector<4x512xi32>
      %35 = arith.sitofp %34 : vector<4x512xi32> to vector<4x512xf32>
      %cst_26 = arith.constant 0.000000e+00 : f32
      %36 = vector.broadcast %cst_26 : f32 to vector<4x512xf32>
      %37 = arith.maximumf %24, %36 : vector<4x512xf32>
      %38 = arith.mulf %24, %31 : vector<4x512xf32>
      %39 = arith.subf %37, %38 : vector<4x512xf32>
      %40 = math.absf %24 : vector<4x512xf32>
      %cst_27 = arith.constant 0.000000e+00 : f32
      %41 = vector.broadcast %cst_27 : f32 to vector<4x512xf32>
      %42 = arith.subf %41, %40 : vector<4x512xf32>
      %43 = math.exp %42 : vector<4x512xf32>
      %44 = math.log1p %43 : vector<4x512xf32>
      %45 = arith.addf %39, %44 : vector<4x512xf32>
      %46 = arith.mulf %35, %31 : vector<4x512xf32>
      %47 = arith.addf %arg10, %45 : vector<4x512xf32>
      %48 = arith.addf %arg11, %46 : vector<4x512xf32>
      %49 = arith.addf %35, %31 : vector<4x512xf32>
      %50 = arith.subf %49, %46 : vector<4x512xf32>
      %51 = arith.addf %arg12, %50 : vector<4x512xf32>
      scf.yield %47, %48, %51 : vector<4x512xf32>, vector<4x512xf32>, vector<4x512xf32>
    }
    %c3_i32_4 = arith.constant 3 : i32
    %c0_5 = arith.constant 0 : index
    %c0_6 = arith.constant 0 : index
    %10 = vector.load %arg6[%c0_5, %c0_6] : memref<4x512xf32, #tpu.memory_space<vmem>>, vector<4x512xf32>
    %11 = arith.addf %10, %9#0 : vector<4x512xf32>
    %c0_7 = arith.constant 0 : index
    %c0_8 = arith.constant 0 : index
    %12 = vector.load %arg6[%c0_7, %c0_8] : memref<4x512xf32, #tpu.memory_space<vmem>>, vector<4x512xf32>
    tpu.vector_store %arg6[%c0_7, %c0_8], %11 {strides = array<i32>} : memref<4x512xf32, #tpu.memory_space<vmem>>, vector<4x512xf32>,
    %c0_9 = arith.constant 0 : index
    %c0_10 = arith.constant 0 : index
    %13 = vector.load %arg7[%c0_9, %c0_10] : memref<4x512xf32, #tpu.memory_space<vmem>>, vector<4x512xf32>
    %14 = arith.addf %13, %9#1 : vector<4x512xf32>
    %c0_11 = arith.constant 0 : index
    %c0_12 = arith.constant 0 : index
    %15 = vector.load %arg7[%c0_11, %c0_12] : memref<4x512xf32, #tpu.memory_space<vmem>>, vector<4x512xf32>
    tpu.vector_store %arg7[%c0_11, %c0_12], %14 {strides = array<i32>} : memref<4x512xf32, #tpu.memory_space<vmem>>, vector<4x512xf32>,
    %c0_13 = arith.constant 0 : index
    %c0_14 = arith.constant 0 : index
    %16 = vector.load %arg8[%c0_13, %c0_14] : memref<4x512xf32, #tpu.memory_space<vmem>>, vector<4x512xf32>
    %17 = arith.addf %16, %9#2 : vector<4x512xf32>
    %c0_15 = arith.constant 0 : index
    %c0_16 = arith.constant 0 : index
    %18 = vector.load %arg8[%c0_15, %c0_16] : memref<4x512xf32, #tpu.memory_space<vmem>>, vector<4x512xf32>
    tpu.vector_store %arg8[%c0_15, %c0_16], %17 {strides = array<i32>} : memref<4x512xf32, #tpu.memory_space<vmem>>, vector<4x512xf32>,
    %c0_i32_17 = arith.constant 0 : i32
    %19 = arith.cmpi eq, %arg1, %c0_i32_17 : i32
    %20 = arith.extui %19 : i1 to i32
    %c0_i32_18 = arith.constant 0 : i32
    %21 = arith.cmpi ne, %20, %c0_i32_18 : i32
    scf.if %21 {
      %c0_19 = arith.constant 0 : index
      %c0_20 = arith.constant 0 : index
      %22 = vector.load %arg6[%c0_19, %c0_20] : memref<4x512xf32, #tpu.memory_space<vmem>>, vector<4x512xf32>
      %cst_21 = arith.constant dense<0.000000e+00> : vector<4xf32>
      %23 = vector.multi_reduction <add>, %22, %cst_21 [1] : vector<4x512xf32> to vector<4xf32>
      %24 = vector.shape_cast %23 : vector<4xf32> to vector<4x1xf32>
      %cst_22 = arith.constant 6.66666659E-4 : f32
      %25 = vector.broadcast %cst_22 : f32 to vector<4x1xf32>
      %26 = arith.mulf %24, %25 : vector<4x1xf32>
      %c0_23 = arith.constant 0 : index
      %c0_24 = arith.constant 0 : index
      %27 = vector.load %arg7[%c0_23, %c0_24] : memref<4x512xf32, #tpu.memory_space<vmem>>, vector<4x512xf32>
      %cst_25 = arith.constant dense<0.000000e+00> : vector<4xf32>
      %28 = vector.multi_reduction <add>, %27, %cst_25 [1] : vector<4x512xf32> to vector<4xf32>
      %29 = vector.shape_cast %28 : vector<4xf32> to vector<4x1xf32>
      %c0_26 = arith.constant 0 : index
      %c0_27 = arith.constant 0 : index
      %30 = vector.load %arg8[%c0_26, %c0_27] : memref<4x512xf32, #tpu.memory_space<vmem>>, vector<4x512xf32>
      %cst_28 = arith.constant dense<0.000000e+00> : vector<4xf32>
      %31 = vector.multi_reduction <add>, %30, %cst_28 [1] : vector<4x512xf32> to vector<4xf32>
      %32 = vector.shape_cast %31 : vector<4xf32> to vector<4x1xf32>
      %cst_29 = arith.constant 9.99999997E-7 : f32
      %33 = vector.broadcast %cst_29 : f32 to vector<4x1xf32>
      %34 = arith.addf %29, %33 : vector<4x1xf32>
      %cst_30 = arith.constant 9.99999997E-7 : f32
      %35 = vector.broadcast %cst_30 : f32 to vector<4x1xf32>
      %36 = arith.addf %32, %35 : vector<4x1xf32>
      %37 = arith.divf %34, %36 : vector<4x1xf32>
      %38 = tpu.iota {dimensions = array<i32: 1>} : vector<4x128xi32>
      %c0_i32_31 = arith.constant 0 : i32
      %39 = vector.broadcast %c0_i32_31 : i32 to vector<4x128xi32>
      %40 = arith.cmpi eq, %38, %39 : vector<4x128xi32>
      %c1_i32_32 = arith.constant 1 : i32
      %41 = vector.broadcast %c1_i32_32 : i32 to vector<4x128xi32>
      %42 = arith.cmpi eq, %38, %41 : vector<4x128xi32>
      %cst_33 = arith.constant 0.000000e+00 : f32
      %43 = vector.shape_cast %37 : vector<4x1xf32> to vector<4x1xf32>
      %44 = vector.broadcast %43 : vector<4x1xf32> to vector<4x128xf32>
      %45 = vector.broadcast %cst_33 : f32 to vector<4x128xf32>
      %46 = arith.select %42, %44, %45 : vector<4x128xi1>, vector<4x128xf32>
      %47 = vector.shape_cast %26 : vector<4x1xf32> to vector<4x1xf32>
      %48 = vector.broadcast %47 : vector<4x1xf32> to vector<4x128xf32>
      %49 = arith.select %40, %48, %46 : vector<4x128xi1>, vector<4x128xf32>
      %c0_34 = arith.constant 0 : index
      %c0_35 = arith.constant 0 : index
      %c0_36 = arith.constant 0 : index
      %50 = vector.load %arg5[%c0_34, %c0_35, %c0_36] : memref<1x4x128xf32, #tpu.memory_space<vmem>>, vector<1x4x128xf32>
      %51 = vector.shape_cast %50 : vector<1x4x128xf32> to vector<4x128xf32>
      %52 = vector.shape_cast %49 : vector<4x128xf32> to vector<1x4x128xf32>
      tpu.vector_store %arg5[%c0_34, %c0_35, %c0_36], %52 {strides = array<i32>} : memref<1x4x128xf32, #tpu.memory_space<vmem>>, vector<1x4x128xf32>,
    } else {
    }
    return
  }
  func.func @transform_0(%arg0: i32, %arg1: i32) -> (i32, i32, i32, i32) {
    %c0_i32 = arith.constant 0 : i32
    %c0_i32_0 = arith.constant 0 : i32
    %c0_i32_1 = arith.constant 0 : i32
    return %arg0, %arg1, %c0_i32, %c0_i32_0 : i32, i32, i32, i32
  }
  func.func @transform_1(%arg0: i32, %arg1: i32) -> (i32, i32, i32) {
    %c0_i32 = arith.constant 0 : i32
    %c0_i32_0 = arith.constant 0 : i32
    %c0_i32_1 = arith.constant 0 : i32
    return %arg0, %c0_i32, %c0_i32_0 : i32, i32, i32
  }
  func.func @transform_2(%arg0: i32, %arg1: i32) -> (i32, i32, i32, i32) {
    %c0_i32 = arith.constant 0 : i32
    %c0_i32_0 = arith.constant 0 : i32
    %c0_i32_1 = arith.constant 0 : i32
    return %arg0, %arg1, %c0_i32, %c0_i32_0 : i32, i32, i32, i32
  }
  func.func @transform_3(%arg0: i32, %arg1: i32) -> (i32, i32, i32) {
    %c0_i32 = arith.constant 0 : i32
    %c0_i32_0 = arith.constant 0 : i32
    %c0_i32_1 = arith.constant 0 : i32
    return %arg0, %c0_i32, %c0_i32_0 : i32, i32, i32
  }
}

</mosaic_0001>

<bundles_post_ra>
// kernel: _mask_stats_packed.1
= control target key start
LH: loop header
LB: loop body
LE: loop exit
PB: predicated region body
PF: predicated region fallthrough
CT: control target
= control target key end

     0   :  { %8 = vsyncpa [#allocation6], 0  ;;  %s1190_s0 = inlined_call_operand.hbm [shape: f32[2,3,4,512], index: 0, kind: input, shape index: {}]   ;;  %s1191_s1 = inlined_call_operand.vmem [shape: s32[2,4,1], index: 1, kind: input, shape index: {}]   ;;  %s1192_s2 = inlined_call_operand.hbm [shape: s32[2,3,1,512], index: 2, kind: input, shape index: {}]   ;;  %s1193_s3 = inlined_call_operand.vmem [shape: f32[2,4,128], index: 3, kind: output, shape index: {}]  }
   0x1   :  { %10 = vsyncpa [#allocation6 + $0x1], 0 }
   0x2   :  { %11 = vsyncpa [#allocation8], 0 }
   0x3   :  { %13 = vsyncpa [#allocation8 + $0x1], 0  ;;  %s1002_s12 = smov 0   ;;  %s1004_s13 = smov 0  }
   0x4   :  { %s1006_s14 = smov 0   ;;  %s1008_s15 = smov 0  }
   0x5   :  { %s1010_s16 = smov 0   ;;  %s1012_s17 = smov 0  }
   0x6 LB: > { %s644_s18 = sadd.s32 4294967295, %s945_s17   ;;  %s31_s19 = sadd.s32 1, %s941_s16  ;;  %s945_s17 = sphi %s1012_s17, %s19_s17   ;;  %s941_s16 = sphi %s1010_s16, %s1206_s16   ;;  %s937_s15 = sphi %s1008_s15, %s1205_s15   ;;  %s933_s14 = sphi %s1006_s14, %s1204_s14   ;;  %s929_s13 = sphi %s1004_s13, %s1203_s13   ;;  %s925_s12 = sphi %s1002_s12, %s1202_s12  }
   0x7   : > { %p33_p0 = scmp.ge.s32.totalorder %s31_s19, 2  ;;  %s40_s20 = sadd.s32 1, %s933_s14 }
   0x8   : > { %p47_p1 = scmp.ne.s32.totalorder %s933_s14, %s929_s13  ;;  %p48_p2 = scmp.eq.s32.totalorder %s945_s17, 0 }
   0x9   : > { %s1208_s19 = smov (%p33_p0, %s31_s19), 0  ;;  %p53_p4 = scmp.ne.s32.totalorder %s929_s13, %s925_s12 }
   0xa   : > { %p49_p3 = por %p48_p2, %p47_p1  ;;  %s35_s21 = ssub.s32 %s941_s16, %s1208_s19 }
   0xb   : > { %p54_p5 = scmp.eq.s32.totalorder %s644_s18, 0  ;;  %p38_p6 = scmp.eq.s32.totalorder %s35_s21, 0 }
   0xc   : > { %p680_p8 = scmp.lt.s32.totalorder %s945_s17, 2  ;;  %s1050_s24 = sand.u32 1, %s933_s14  }
   0xd   : > { %p1041_p7 = por %p54_p5, %p53_p4  ;;  %s664_s25 = smul.u32 48, %s941_s16 }
   0xe   : > { %s1047_s23 = scalar_select %p38_p6, %s933_s14, %s40_s20  }
   0xf   : > { %s663_s26 = smul.u32 48, %s1050_s24  ;;  %s169_s29 = scalar_lea.hbm %s1190_s0, %s664_s25 }
  0x10   : > { %p1057_p9 = pnand %p680_p8, %p49_p3  ;;  %s170_s4 = sshll.u32 %s169_s29, 4  ;;  %s171_s4 = int_to_ptr.hbm [resolvable:$true] %s170_s4 }
  0x11   : > { %s161_s5 = scalar_lea.vmem [#allocation5], %s663_s26  ;;  %s158_s7 = scalar_lea.sflag [#allocation6], %s1050_s24 }
  0x12   : > { %s172_s6 = sshll.u32 %s161_s5, 4  ;;  %s975_s8 = smov 256   ;;  %s173_s6 = int_to_ptr.vmem [resolvable:$true] %s172_s6 }
  0x13   : > { %s976_s9 = smov 16   ;;  %p649_p10 = scmp.ge.s32.totalorder %s945_s17, 1 }
  0x14   : > { %676 = dma.hbm_to_vmem [thread:$0]  (!%p1057_p9), %s171_s4, 768, %s173_s6, %s158_s7, %s975_s8, %s975_s8, %s976_s9  }
  0x15   : > { %p211_p11 = scmp.lt.s32.totalorder %s945_s17, 3  ;;  %s665_s10 = smul.u32 12, %s1050_s24 }
  0x16   : > { %s666_s11 = smul.u32 12, %s941_s16  ;;  %s190_s27 = scalar_lea.sflag [#allocation8], %s1050_s24 }
  0x17   : > { %p212_p12 = pnand %p649_p10, %p211_p11  ;;  %s193_s21 = scalar_lea.vmem [#allocation7], %s665_s10 }
  0x18   : > { %s200_s20 = scalar_lea.hbm %s1192_s2, %s666_s11  ;;  %s203_s25 = sshll.u32 %s193_s21, 4  ;;  %s204_s25 = int_to_ptr.vmem [resolvable:$true] %s203_s25 }
  0x19   : > { %s201_s26 = sshll.u32 %s200_s20, 4  ;;  %s977_s28 = smov 64   ;;  %s202_s26 = int_to_ptr.hbm [resolvable:$true] %s201_s26 }
  0x1a   : > { %s978_s29 = smov 4   ;;  %215 = sbr.rel (%p212_p12) target bundleno = 373 (0x175), region = 32 }
  0x1b   : > { %679 = dma.hbm_to_vmem [thread:$0]  (!%p1057_p9), %s202_s26, 192, %s204_s25, %s190_s27, %s977_s28, %s977_s28, %s978_s29  }
  0x1c   : > { %s217_s4 = sand.u32 (!%p212_p12), 1, %s929_s13  }
  0x1d   : > { %s667_s5 = smul.u32 (!%p212_p12), 48, %s217_s4  ;;  %s218_s6 = scalar_lea.sflag (!%p212_p12), [#allocation6], %s217_s4 }
  0x1f   : > { %s1075_s7 = scalar_lea.vmem [#allocation5], %s667_s5 }
  0x20   : > { %916 = dma.done.wait (%p1041_p7), %s218_s6, 768  }
  0x21   : > { %918 = vsyncadd (%p1041_p7), %s218_s6, 4294966528  ;;  %s668_s8 = smul.u32 12, %s217_s4  ;;  %s228_s24 = scalar_lea.sflag [#allocation8], %s217_s4 }
  0x23   : > { %s1081_s9 = scalar_lea.vmem [#allocation7], %s668_s8 }
  0x24   : > { %920 = dma.done.wait (%p1041_p7), %s228_s24, 192  }
  0x25   : > { %922 = vsyncadd (%p1041_p7), %s228_s24, 4294967104  ;;  %p264_p13 = scmp.lt.s32.totalorder %s937_s15, 1  ;;  %v979_v0 = vmov 0.0   ;;  %v980_v1 = vmov 0   ;;  %v1099_v4 = vmov 0.0   ;;  %v1101_v5 = vmov 0.0  }
  0x26   : > { %277 = vst [vmem:[#allocation2] sm:$0xff] %v979_v0  ;;  %792 = vset.pattern.permute.xlu0 %v980_v1  ;;  %v1103_v6 = vmov 0.0   ;;  %v1105_v7 = vmov 0.0   ;;  %v1107_v8 = vmov 0.0   ;;  %v1109_v9 = vmov 0.0  }
  0x27   : > { %278 = vst [vmem:[#allocation2 + $0x8] sm:$0xff] %v979_v0  ;;  %s1210_s15 = smov (!%p264_p13, %s937_s15), 1 }
  0x28   : > { %279 = vst [vmem:[#allocation3 + $0x8] sm:$0xff] %v979_v0  ;;  %s650_s30 = sshll.u32 %s1210_s15, 2  ;;  %s1111_s15 = smov 0  }
  0x29   : > { %280 = vst [vmem:[#allocation3] sm:$0xff] %v979_v0  ;;  %s267_s12 = scalar_lea.vmem %s1191_s1, %s650_s30  ;;  %s1095_s20 = scalar_lea.vmem %s1193_s3, %s650_s30 }
  0x2a   : > { %281 = vst [vmem:[#allocation4 + $0x8] sm:$0xff] %v979_v0  ;;  %v283_v2 = vld [vmem:[%s267_s12] sm:$0xf] }
  0x2b   : > { %282 = vst [vmem:[#allocation4] sm:$0xff] %v979_v0  ;;  %285 = vperm.xlu0 %792, %v283_v2  }
  0x9d   : > { %v1097_v3 = vpop.permute.xlu0 %285 }
  0x9e LB: >> { %s652_s21 = sshll.u32 %s973_s15, 2  ;;  %s662_s25 = sshll.u32 %s973_s15, 4  ;;  %v981_v17 = vmov 0.0   ;;  %vm336_vm6 = vcmask 1043456   ;;  %s973_s15 = sphi %s1111_s15, %s292_s15   ;;  %v969_v9 = vphi %v1109_v9, %v1201_v9   ;;  %v965_v8 = vphi %v1107_v8, %v1200_v8   ;;  %v961_v7 = vphi %v1105_v7, %v1199_v7   ;;  %v957_v6 = vphi %v1103_v6, %v1198_v6   ;;  %v953_v5 = vphi %v1101_v5, %v1197_v5   ;;  %v949_v4 = vphi %v1099_v4, %v1196_v4  }
  0x9f   : >> { %s301_s26 = scalar_lea.vmem %s1075_s7, %s662_s25 [#allocation5]  ;;  %s304_s27 = scalar_lea.vmem %s1081_s9, %s652_s21 [#allocation7] }
  0xa0   : >> { %v305_v10 = vld [vmem:[%s304_s27] sm:$0xf]  ;;  %v1130_v12 = vld [vmem:[%s301_s26 + $0x8] sm:$0xff]  ;;  %s292_s15 = sadd.s32 1, %s973_s15  }
  0xa1   : >> { %v302_v11 = vld [vmem:[%s301_s26] sm:$0xff]  ;;  %v306_v13 = vperm.slane %v305_v10, 0  ;;  %v307_v14 = vperm.slane %v305_v10, 1  ;;  %v308_v15 = vperm.slane %v305_v10, 2  ;;  %v309_v16 = vperm.slane %v305_v10, 3  ;;  %p289_p0 = scmp.ge.s32.totalorder %s292_s15, 3  }
  0xa2   : >> { %vm322_vm0 = vcmp.gt.f32.partialorder %v302_v11, 0.0  ;;  %vm323_vm1 = vcmp.gt.f32.partialorder %v1130_v12, 0.0  ;;  %v345_v26 = vand.u32 2147483647, %v302_v11  ;;  %v346_v27 = vand.u32 2147483647, %v1130_v12 }
  0xa3   : >> { %vm310_vm2 = vcmp.eq.s32.totalorder %v306_v13, %v1097_v3  ;;  %vm311_vm3 = vcmp.eq.s32.totalorder %v307_v14, %v1097_v3  ;;  %vm312_vm4 = vcmp.eq.s32.totalorder %v308_v15, %v1097_v3  ;;  %vm313_vm5 = vcmp.eq.s32.totalorder %v309_v16, %v1097_v3  ;;  %v391_v13 = vld [vmem:[#allocation3 + $0x8] sm:$0xff] (%p289_p0)  ;;  %v392_v15 = vld [vmem:[#allocation3] sm:$0xff] (%p289_p0) }
  0xa4   : >> { %v655_v18 = vsel %vm311_vm3, 1.0, %v981_v17  ;;  %v657_v19 = vsel %vm313_vm5, 1.0, %v981_v17  ;;  %v654_v20 = vsel %vm310_vm2, 1.0, %v981_v17  ;;  %v656_v21 = vsel %vm312_vm4, 1.0, %v981_v17 }
  0xa5   : >> { %v334_v22 = vrot.slane %v655_v18, 4  ;;  %v335_v23 = vrot.slane %v657_v19, 4  ;;  %v658_v24 = vsel %vm322_vm0, 1.0, %v981_v17  ;;  %v659_v25 = vsel %vm323_vm1, 1.0, %v981_v17  ;;  %v397_v17 = vld [vmem:[#allocation4 + $0x8] sm:$0xff] (%p289_p0)  ;;  %v398_v19 = vld [vmem:[#allocation4] sm:$0xff] (%p289_p0) }
  0xa6   : >> { %v347_v30 = vsub.f32 0.0, %v345_v26  ;;  %v348_v31 = vsub.f32 0.0, %v346_v27  ;;  %v328_v51 = vmax.f32 %v302_v11, 0.0  ;;  %v329_v55 = vmax.f32 %v1130_v12, 0.0 }
  0xa7   : >> { %v337_v28 = vsel %vm336_vm6, %v654_v20, %v334_v22  ;;  %v338_v29 = vsel %vm336_vm6, %v656_v21, %v335_v23 }
  0xa8   : >> { %v373_v32 = vmul.f32 %v658_v24, %v337_v28  ;;  %v374_v33 = vmul.f32 %v659_v25, %v338_v29  ;;  %v379_v34 = vadd.f32 %v658_v24, %v337_v28  ;;  %v380_v35 = vadd.f32 %v659_v25, %v338_v29 }
  0xa9   : >> { %v349_v36 = vmul.f32 1.442695, %v347_v30  ;;  %v351_v37 = vmul.f32 1.442695, %v348_v31  ;;  %v341_v52 = vmul.f32 %v337_v28, %v302_v11  ;;  %v342_v56 = vmul.f32 %v338_v29, %v1130_v12  ;;  %v386_v12 = vld [vmem:[#allocation2 + $0x8] sm:$0xff] (%p289_p0) }
  0xaa   : >> { %v377_v38 = vadd.f32 %v961_v7, %v373_v32   ;;  %v378_v39 = vadd.f32 %v957_v6, %v374_v33   ;;  %v381_v40 = vsub.f32 %v379_v34, %v373_v32  ;;  %v382_v41 = vsub.f32 %v380_v35, %v374_v33 }
  0xab   : >> { %793 = vpow2.f32 %v349_v36  ;;  %v343_v60 = vsub.f32 %v328_v51, %v341_v52  ;;  %v344_v63 = vsub.f32 %v329_v55, %v342_v56 }
  0xac   : >> { %795 = vpow2.f32 %v351_v37  ;;  %v383_v42 = vadd.f32 %v953_v5, %v381_v40   ;;  %v384_v43 = vadd.f32 %v949_v4, %v382_v41   ;;  %v1199_v7 = vmov %v377_v38 }
  0xad   : > { %v393_v18 = vadd.f32 (%p289_p0), %v391_v13, %v377_v38  ;;  %v394_v20 = vadd.f32 (%p289_p0), %v392_v15, %v378_v39 }
  0xae   : > { %v399_v21 = vadd.f32 (%p289_p0), %v397_v17, %v383_v42  ;;  %v400_v22 = vadd.f32 (%p289_p0), %v398_v19, %v384_v43 }
  0xaf   : > { %395 = vst [vmem:[#allocation3 + $0x8] sm:$0xff] (%p289_p0), %v393_v18 }
  0xb0   : > { %396 = vst [vmem:[#allocation3] sm:$0xff] (%p289_p0), %v394_v20 }
  0xb1   : >> { %v794_v44 = vpop.eup %793  ;;  %401 = vst [vmem:[#allocation4 + $0x8] sm:$0xff] (%p289_p0), %v399_v21 }
  0xb2   : >> { %v796_v45 = vpop.eup %795  ;;  %v353_v46 = vadd.f32 1.0, %v794_v44  ;;  %v356_v47 = vmul.f32 -0.5, %v794_v44  ;;  %v359_v53 = vand.u32 2147483647, %v794_v44  ;;  %402 = vst [vmem:[#allocation4] sm:$0xff] (%p289_p0), %v400_v22 }
  0xb3   : >> { %v362_v48 = vadd.f32 1.0, %v796_v45  ;;  %v365_v49 = vmul.f32 -0.5, %v796_v45  ;;  %v368_v57 = vand.u32 2147483647, %v796_v45 }
  0xb4   : >> { %797 = vlog2.f32 %v353_v46  ;;  %v357_v50 = vadd.f32 1.0, %v356_v47  ;;  %vm360_vm7 = vcmp.lt.f32.partialorder %v359_v53, 0.0004427343 }
  0xb5   : >> { %799 = vlog2.f32 %v362_v48  ;;  %v366_v54 = vadd.f32 1.0, %v365_v49  ;;  %vm369_vm8 = vcmp.lt.f32.partialorder %v368_v57, 0.0004427343  ;;  %v497_v57 = vlaneseq (%p289_p0) }
  0xb6   : >> { %v358_v58 = vmul.f32 %v794_v44, %v357_v50 }
  0xb7   : >> { %v367_v61 = vmul.f32 %v796_v45, %v366_v54 }
  0xba   : >> { %v798_v59 = vpop.eup %797 }
  0xbb   : >> { %v800_v62 = vpop.eup %799  ;;  %v355_v0 = vmul.f32 0.6931472, %v798_v59 }
  0xbc   : >> { %v364_v1 = vmul.f32 0.6931472, %v800_v62 }
  0xbd   : >> { %v361_v2 = vsel %vm360_vm7, %v358_v58, %v355_v0 }
  0xbe   : >> { %v370_v4 = vsel %vm369_vm8, %v367_v61, %v364_v1  ;;  %v371_v5 = vadd.f32 %v361_v2, %v343_v60 }
  0xbf   : >> { %v372_v6 = vadd.f32 %v370_v4, %v344_v63  ;;  %v1196_v4 = vmov %v384_v43  ;;  %291 = sbr.rel (!%p289_p0) target bundleno = 158 (0x9e), region = 108  ;;  %v498_v63 = vand.u32 (%p289_p0), 127, %v497_v57 }
  0xc0   : >> { %v375_v10 = vadd.f32 %v969_v9, %v371_v5   ;;  %v1197_v5 = vmov %v383_v42 }
  0xc1   : >> { %v376_v11 = vadd.f32 %v965_v8, %v372_v6   ;;  %v1198_v6 = vmov %v378_v39  ;;  %vm500_vm13 = vcmp.eq.s32.totalorder (%p289_p0), %v498_v63, 1  ;;  %vm499_vm14 = vcmp.eq.s32.totalorder (%p289_p0), %v498_v63, 0 }
  0xc2   : >> { %v1201_v9 = vmov %v375_v10 }
  0xc3   : >> { %v1200_v8 = vmov %v376_v11  ;;  %v385_v9 = vld [vmem:[#allocation2] sm:$0xff] (%p289_p0)  ;;  %v388_v16 = vadd.f32 (%p289_p0), %v386_v12, %v376_v11 }
  0xc4   : > { %v387_v14 = vadd.f32 %v385_v9, %v375_v10 }
  0xc5   : > { %390 = vst [vmem:[#allocation2 + $0x8] sm:$0xff] %v388_v16 }
  0xc6   : > { %389 = vst [vmem:[#allocation2] sm:$0xff] %v387_v14 }
  0xc7   : > { %410 = vst [vmem:[#allocation1] ss:$2 sm:$0xff] %v387_v14 }
  0xc8   : > { %412 = vst [vmem:[#allocation1 + $0x10] ss:$2 sm:$0xff] %v388_v16 }
  0xce   : > { %v413_v3 = vld.sshfl [vmem:[#allocation1] sm:$0xff pattern:$0x75316420]  ;;  %v414_v7 = vld.sshfl [vmem:[#allocation1 + $0x8] sm:$0xff pattern:$0x75316420] }
  0xcf   : > { %v415_v8 = vld.sshfl [vmem:[#allocation1 + $0x10] sm:$0xff pattern:$0x75316420]  ;;  %v416_v23 = vld.sshfl [vmem:[#allocation1 + $0x18] sm:$0xff pattern:$0x75316420] }
  0xd0   : > { %436 = vst [vmem:[#allocation1] ss:$2 sm:$0xff] %v393_v18  ;;  %v422_v24 = vsel %vm336_vm6, %v413_v3, 0.0  ;;  %v423_v25 = vsel %vm336_vm6, %v414_v7, 0.0  ;;  %v425_v26 = vsel %vm336_vm6, %v415_v8, 0.0  ;;  %v427_v28 = vsel %vm336_vm6, %v416_v23, 0.0 }
  0xd1   : > { %438 = vst [vmem:[#allocation1 + $0x10] ss:$2 sm:$0xff] %v394_v20  ;;  %v424_v27 = vadd.f32 %v423_v25, %v422_v24 }
  0xd3   : > { %v426_v29 = vadd.f32 %v425_v26, %v424_v27 }
  0xd5   : > { %v428_v30 = vadd.f32 %v427_v28, %v426_v29 }
  0xd7   : > { %v439_v31 = vld.sshfl [vmem:[#allocation1] sm:$0xff pattern:$0x75316420]  ;;  %v440_v32 = vld.sshfl [vmem:[#allocation1 + $0x8] sm:$0xff pattern:$0x75316420]  ;;  %429 = vadd.xlane.f32.xlu1 %v428_v30 }
  0xd8   : > { %v441_v33 = vld.sshfl [vmem:[#allocation1 + $0x10] sm:$0xff pattern:$0x75316420]  ;;  %v442_v34 = vld.sshfl [vmem:[#allocation1 + $0x18] sm:$0xff pattern:$0x75316420] }
  0xd9   : > { %460 = vst [vmem:[#allocation1] ss:$2 sm:$0xff] %v399_v21  ;;  %v447_v35 = vsel %vm336_vm6, %v439_v31, 0.0  ;;  %v448_v43 = vsel %vm336_vm6, %v440_v32, 0.0  ;;  %v450_v48 = vsel %vm336_vm6, %v441_v33, 0.0  ;;  %v452_v51 = vsel %vm336_vm6, %v442_v34, 0.0 }
  0xda   : > { %462 = vst [vmem:[#allocation1 + $0x10] ss:$2 sm:$0xff] %v400_v22  ;;  %v449_v47 = vadd.f32 %v448_v43, %v447_v35 }
  0xdc   : > { %v451_v50 = vadd.f32 %v450_v48, %v449_v47 }
  0xde   : > { %v453_v52 = vadd.f32 %v452_v51, %v451_v50 }
  0xe0   : > { %v463_v36 = vld.sshfl [vmem:[#allocation1] sm:$0xff pattern:$0x75316420]  ;;  %v464_v37 = vld.sshfl [vmem:[#allocation1 + $0x8] sm:$0xff pattern:$0x75316420] }
  0xe1   : > { %v465_v38 = vld.sshfl [vmem:[#allocation1 + $0x10] sm:$0xff pattern:$0x75316420]  ;;  %v466_v39 = vld.sshfl [vmem:[#allocation1 + $0x18] sm:$0xff pattern:$0x75316420] }
  0xe2   : > { %v471_v40 = vsel %vm336_vm6, %v463_v36, 0.0  ;;  %v472_v41 = vsel %vm336_vm6, %v464_v37, 0.0  ;;  %v474_v42 = vsel %vm336_vm6, %v465_v38, 0.0  ;;  %v476_v45 = vsel %vm336_vm6, %v466_v39, 0.0 }
  0xe3   : > { %v473_v44 = vadd.f32 %v472_v41, %v471_v40 }
  0xe5   : > { %v475_v46 = vadd.f32 %v474_v42, %v473_v44 }
  0xe7   : > { %v477_v49 = vadd.f32 %v476_v45, %v475_v46 }
  0xe9   : > { %478 = vadd.xlane.f32.xlu0 %v477_v49 }
  0xf1   : > { %454 = vadd.xlane.f32.xlu0 %v453_v52 }
 0x14a   : > { %v430_v2 = vpop.xlane.xlu1 %429 }
 0x14b   : > { %v431_v10 = vmul.f32 0.00066666666, %v430_v2 }
 0x15c   : > { %v479_v53 = vpop.xlane.xlu0 %478 }
 0x15d   : > { %v481_v54 = vadd.f32 1e-06, %v479_v53 }
 0x15f   : > { %801 = vrcp.f32 %v481_v54  ;;  %v493_v59 = vand.u32 2147483648, %v481_v54  ;;  %v491_v62 = vand.u32 2147483647, %v481_v54  ;;  %vm487_vm10 = vweird.f32 %v481_v54 }
 0x161   : > { %v494_v4 = vor.u32 1.1754944e-38, %v493_v59  ;;  %vm492_vm12 = vcmp.eq.f32.partialorder %v491_v62, 8.507059e+37 }
 0x164   : > { %v455_v60 = vpop.xlane.xlu0 %454 }
 0x165   : > { %v802_v55 = vpop.eup %801  ;;  %v480_v1 = vadd.f32 1e-06, %v455_v60 }
 0x166   : > { %v483_v56 = vmul.f32 %v802_v55, %v481_v54  ;;  %vm488_vm9 = vweird.f32 %v802_v55 }
 0x167   : > { %vm489_vm11 = vmor %vm487_vm10, %vm488_vm9 }
 0x168   : > { %v484_v58 = vsub.f32 1.0, %v483_v56 }
 0x16a   : > { %v485_v61 = vmul.f32 %v802_v55, %v484_v58 }
 0x16c   : > { %v486_v0 = vadd.f32 %v802_v55, %v485_v61 }
 0x16e   : > { %v490_v5 = vsel %vm489_vm11, %v802_v55, %v486_v0 }
 0x16f   : > { %v495_v6 = vsel %vm492_vm12, %v494_v4, %v490_v5 }
 0x170   : > { %v496_v11 = vmul.f32 %v495_v6, %v480_v1 }
 0x172   : > { %v501_v9 = vsel %vm500_vm13, %v496_v11, 0.0 }
 0x173   : > { %v502_v12 = vsel %vm499_vm14, %v431_v10, %v501_v9 }
 0x174   : > { %503 = vst [vmem:[%s1095_s20] sm:$0xf] %v502_v12 }
 0x175 PF: > { %s19_s17 = sadd.s32 1, %s945_s17   ;;  %s1202_s12 = smov %s929_s13 }
 0x176   : > { %p16_p1 = scmp.ge.s32.totalorder %s19_s17, 4   ;;  %s1203_s13 = smov %s933_s14 }
 0x177   : > { %s1204_s14 = smov %s1047_s23  ;;  %s1205_s15 = smov %s941_s16 }
 0x178   : > { %s1206_s16 = smov %s1208_s19  ;;  %18 = sbr.rel (!%p16_p1) target bundleno = 6 (0x6), region = 119 }
 0x17d   :  { %523 = vsyncpa [#allocation6], 1 }
 0x17e   :  { %525 = vsyncpa [#allocation6 + $0x1], 1 }
 0x17f   :  { %526 = vsyncpa [#allocation8], 1 }
 0x180   :  { %528 = vsyncpa [#allocation8 + $0x1], 1 }

</bundles_post_ra>
